<compile_context>
chip_gen: v7x
topology: tpu7x:2x2x1
jax: 0.10.0
libtpu: 0.0.40
codegen_flags: <defaults>
</compile_context>

<pallas_src>
import functools

import jax
import jax.numpy as jnp
from jax.experimental import pallas as pl
from jax.experimental.pallas import tpu as pltpu

DEFAULT_DT = 0.01
DEFAULT_RF_THETA = 0.1
DEFAULT_RF_B_offset = 1.0
DEFAULT_RF_OMEGA = 10.0
DEFAULT_RF_ADAPTIVE_B_offset_a = 0.0
DEFAULT_RF_ADAPTIVE_B_offset_b = 3.0


# ----------------------------------------------------------------------------
# helpers
# ----------------------------------------------------------------------------
def _round_up(x, m):
    return ((x + m - 1) // m) * m


def _pad_last2(a, rows, cols):
    pr = rows - a.shape[-2]
    pc = cols - a.shape[-1]
    if pr == 0 and pc == 0:
        return a
    pad = [(0, 0)] * (a.ndim - 2) + [(0, pr), (0, pc)]
    return jnp.pad(a, pad)


def _select_config():
    """Generation-aware tile targets and scoped-VMEM budget."""
    kind = ""
    try:
        kind = jax.devices()[0].device_kind.lower()
    except Exception:
        pass
    if "v6" in kind:
        # v6e: 128 MiB VMEM, 2x256^2 MXU -> large lane-dense tiles.
        return dict(tm=256, tn=1024, tk=1024, vmem=64 * 1024 * 1024)
    if "v5" in kind:
        # v5e/v5p: 128 MiB VMEM, 128-wide MXU granularity.
        return dict(tm=256, tn=512, tk=512, vmem=64 * 1024 * 1024)
    # v7x (64 MiB physical VMEM) and unknown chips: conservative budget.
    return dict(tm=256, tn=512, tk=512, vmem=32 * 1024 * 1024)


def _sublane(z_dtype):
    # sub-32-bit spike output packs 2x along sublanes -> pad batch to 16.
    return 8 if jnp.dtype(z_dtype).itemsize >= 4 else 16


# ----------------------------------------------------------------------------
# single-step kernel (== RFCell.forward)
# ----------------------------------------------------------------------------
def _rf_step_kernel(x_ref, wT_ref, u_ref, v_ref, a_ref, w_ref,
                    z_ref, u_out_ref, v_out_ref, acc_ref, *, dt, theta):
    k = pl.program_id(2)

    @pl.when(k == 0)
    def _():
        acc_ref[...] = jnp.zeros_like(acc_ref)

    # in_sum partial product on the MXU, accumulated over the I (K) grid axis.
    acc_ref[...] += jnp.dot(x_ref[...], wT_ref[...],
                            preferred_element_type=jnp.float32)

    @pl.when(k == pl.num_programs(2) - 1)
    def _():
        u = u_ref[...]
        v = v_ref[...]
        a = a_ref[...]        # (1, tn): a = 1 + b*dt  (b = -|b_offset|)
        w = w_ref[...]        # (1, tn): w = |omega|*dt
        u_new = a * u - w * v + acc_ref[...] * dt
        v_new = w * u + a * v
        # TODO(synk): FGI_DGaussian only changes the backward (surrogate)
        # gradient; the forward value is the hard threshold implemented here.
        z_ref[...] = (u_new - theta > 0.0).astype(z_ref.dtype)
        u_out_ref[...] = u_new
        v_out_ref[...] = v_new


def rf_cell_forward(x, wT, u, v, omega, b_offset,
                    dt=DEFAULT_DT, theta=DEFAULT_RF_THETA,
                    z_dtype=jnp.float32):
    """One RFCell step.  x:(B,I), wT:(I,H), u/v:(B,H), omega/b_offset:(H,)."""
    B, I = x.shape
    H = wT.shape[1]
    cfg = _select_config()
    tm = min(cfg["tm"], _round_up(B, _sublane(z_dtype)))
    tn = min(cfg["tn"], _round_up(H, 128))
    tk = min(cfg["tk"], _round_up(I, 128))
    Bp, Hp, Ip = _round_up(B, tm), _round_up(H, tn), _round_up(I, tk)

    # hoist abs / negate / dt-scale of the (1,H) parameters out of the kernel
    a_coef = (1.0 - jnp.abs(b_offset) * dt).astype(jnp.float32).reshape(1, H)
    w_dt = (jnp.abs(omega) * dt).astype(jnp.float32).reshape(1, H)

    xp = _pad_last2(x.astype(jnp.float32), Bp, Ip)
    wp = _pad_last2(wT.astype(jnp.float32), Ip, Hp)
    up = _pad_last2(u.astype(jnp.float32), Bp, Hp)
    vp = _pad_last2(v.astype(jnp.float32), Bp, Hp)
    ap = _pad_last2(a_coef, 1, Hp)
    wdp = _pad_last2(w_dt, 1, Hp)

    grid = (Bp // tm, Hp // tn, Ip // tk)
    bh = pl.BlockSpec((tm, tn), lambda i, j, k: (i, j))
    out_shapes = (jax.ShapeDtypeStruct((Bp, Hp), z_dtype),
                  jax.ShapeDtypeStruct((Bp, Hp), jnp.float32),
                  jax.ShapeDtypeStruct((Bp, Hp), jnp.float32))

    flops = 2 * Bp * Hp * Ip + 8 * Bp * Hp
    bytes_accessed = 4 * (Bp * Ip + Ip * Hp + 5 * Bp * Hp)

    z, u_new, v_new = pl.pallas_call(
        functools.partial(_rf_step_kernel, dt=float(dt), theta=float(theta)),
        out_shape=out_shapes,
        grid=grid,
        in_specs=[
            pl.BlockSpec((tm, tk), lambda i, j, k: (i, k)),    # x
            pl.BlockSpec((tk, tn), lambda i, j, k: (k, j)),    # wT
            bh,                                                # u (resident over k)
            bh,                                                # v
            pl.BlockSpec((1, tn), lambda i, j, k: (0, j)),     # a_coef
            pl.BlockSpec((1, tn), lambda i, j, k: (0, j)),     # w_dt
        ],
        out_specs=(bh, bh, bh),
        scratch_shapes=[pltpu.VMEM((tm, tn), jnp.float32)],
        compiler_params=pltpu.CompilerParams(
            dimension_semantics=("parallel", "parallel", "arbitrary"),
            vmem_limit_bytes=cfg["vmem"]),
        cost_estimate=pl.CostEstimate(flops=flops, transcendentals=0,
                                      bytes_accessed=bytes_accessed),
    )(xp, wp, up, vp, ap, wdp)

    return z[:B, :H], u_new[:B, :H], v_new[:B, :H]


# ----------------------------------------------------------------------------
# fused multi-timestep kernel (time loop inside one pallas_call):
# weights + u/v state stay resident in VMEM across all timesteps.
# ----------------------------------------------------------------------------
def _rf_seq_kernel(x_ref, wTdt_ref, u0_ref, v0_ref, a_ref, w_ref,
                   z_ref, u_out_ref, v_out_ref, u_sc, v_sc, *, theta):
    t = pl.program_id(2)

    @pl.when(t == 0)
    def _():
        u_sc[...] = u0_ref[...]
        v_sc[...] = v0_ref[...]

    # wTdt already carries the dt scale -> no per-step (tm,tn) mul needed.
    in_sum_dt = jnp.dot(x_ref[0], wTdt_ref[...],
                        preferred_element_type=jnp.float32)
    a = a_ref[...]
    w = w_ref[...]
    u = u_sc[...]
    v = v_sc[...]
    u_new = a * u - w * v + in_sum_dt
    v_new = w * u + a * v
    u_sc[...] = u_new
    v_sc[...] = v_new
    z_ref[0] = (u_new - theta > 0.0).astype(z_ref.dtype)

    @pl.when(t == pl.num_programs(2) - 1)
    def _():
        u_out_ref[...] = u_new
        v_out_ref[...] = v_new


def rf_cell_sequence(xs, wT, u0, v0, omega, b_offset,
                     dt=DEFAULT_DT, theta=DEFAULT_RF_THETA,
                     z_dtype=jnp.float32):
    """Run the RFCell recurrence over xs:(T,B,I).  Returns (z:(T,B,H), u_T, v_T)."""
    T, B, I = xs.shape
    H = wT.shape[1]
    cfg = _select_config()
    tm = min(cfg["tm"], _round_up(B, _sublane(z_dtype)))
    tn = min(cfg["tn"], _round_up(H, 128))
    # TODO(synk): for very large input_size, additionally K-tile the weight
    # with an in-kernel loop; here the full (padded) I stays resident per tile.
    Ip = _round_up(I, 128)
    Bp, Hp = _round_up(B, tm), _round_up(H, tn)

    a_coef = (1.0 - jnp.abs(b_offset) * dt).astype(jnp.float32).reshape(1, H)
    w_dt = (jnp.abs(omega) * dt).astype(jnp.float32).reshape(1, H)
    # fold dt into the weight once (it is resident across all T steps).
    wT_dt = (wT.astype(jnp.float32) * dt)

    if Bp == B and Ip == I:
        xp = xs.astype(jnp.float32)
    else:
        xp = jnp.pad(xs.astype(jnp.float32),
                     ((0, 0), (0, Bp - B), (0, Ip - I)))
    wp = _pad_last2(wT_dt, Ip, Hp)
    up = _pad_last2(u0.astype(jnp.float32), Bp, Hp)
    vp = _pad_last2(v0.astype(jnp.float32), Bp, Hp)
    ap = _pad_last2(a_coef, 1, Hp)
    wdp = _pad_last2(w_dt, 1, Hp)

    grid = (Bp // tm, Hp // tn, T)   # time innermost, "arbitrary"
    bh = pl.BlockSpec((tm, tn), lambda i, j, t: (i, j))
    out_shapes = (jax.ShapeDtypeStruct((T, Bp, Hp), z_dtype),
                  jax.ShapeDtypeStruct((Bp, Hp), jnp.float32),
                  jax.ShapeDtypeStruct((Bp, Hp), jnp.float32))

    flops = T * (2 * Bp * Hp * Ip + 7 * Bp * Hp)
    bytes_accessed = 4 * (T * Bp * Ip + Ip * Hp + 4 * Bp * Hp) \
        + T * Bp * Hp * jnp.dtype(z_dtype).itemsize

    z, u_f, v_f = pl.pallas_call(
        functools.partial(_rf_seq_kernel, theta=float(theta)),
        out_shape=out_shapes,
        grid=grid,
        in_specs=[
            pl.BlockSpec((1, tm, Ip), lambda i, j, t: (t, i, 0)),  # x_t
            pl.BlockSpec((Ip, tn), lambda i, j, t: (0, j)),        # wT*dt (resident over t)
            bh,                                                    # u0 (resident over t)
            bh,                                                    # v0
            pl.BlockSpec((1, tn), lambda i, j, t: (0, j)),         # a_coef
            pl.BlockSpec((1, tn), lambda i, j, t: (0, j)),         # w_dt
        ],
        out_specs=(
            pl.BlockSpec((1, tm, tn), lambda i, j, t: (t, i, j)),  # z per step
            bh,                                                    # final u
            bh,                                                    # final v
        ),
        scratch_shapes=[pltpu.VMEM((tm, tn), jnp.float32),
                        pltpu.VMEM((tm, tn), jnp.float32)],
        compiler_params=pltpu.CompilerParams(
            dimension_semantics=("parallel", "parallel", "arbitrary"),
            vmem_limit_bytes=cfg["vmem"]),
        cost_estimate=pl.CostEstimate(flops=flops, transcendentals=0,
                                      bytes_accessed=bytes_accessed),
    )(xp, wp, up, vp, ap, wdp)

    return z[:, :B, :H], u_f[:B, :H], v_f[:B, :H]


# ----------------------------------------------------------------------------
# parameter init (matches the PyTorch module defaults)
# ----------------------------------------------------------------------------
def init_params(key, input_size, layer_size):
    kw, kb = jax.random.split(key)
    # Xavier uniform for the Linear weight (PyTorch shape (layer_size, input_size));
    # we keep its transpose (input_size, layer_size) for the kernel.
    limit = (6.0 / (input_size + layer_size)) ** 0.5
    wT = jax.random.uniform(kw, (input_size, layer_size),
                            minval=-limit, maxval=limit, dtype=jnp.float32)
    omega = jnp.full((layer_size,), DEFAULT_RF_OMEGA, dtype=jnp.float32)
    b_offset = jax.random.uniform(
        kb, (layer_size,),
        minval=DEFAULT_RF_ADAPTIVE_B_offset_a,
        maxval=DEFAULT_RF_ADAPTIVE_B_offset_b,
        dtype=jnp.float32)
    return wT, omega, b_offset


if __name__ == "__main__":
    key = jax.random.PRNGKey(0)
    k_params, k_x, k_u, k_v, k_xs = jax.random.split(key, 5)

    batch, input_size, layer_size, seq = 2, 16, 32, 8
    dt, theta = DEFAULT_DT, DEFAULT_RF_THETA

    wT, omega, b_offset = init_params(k_params, input_size, layer_size)

    x = jax.random.normal(k_x, (batch, input_size), dtype=jnp.float32)
    u0 = 0.1 * jax.random.normal(k_u, (batch, layer_size), dtype=jnp.float32)
    v0 = 0.1 * jax.random.normal(k_v, (batch, layer_size), dtype=jnp.float32)

    # --- single-step RFCell.forward (semantics of the PyTorch module) ---
    z, u1, v1 = rf_cell_forward(x, wT, u0, v0, omega, b_offset, dt=dt, theta=theta)
    jax.block_until_ready((z, u1, v1))

    # pure-JAX reference (original formulation)
    b = -jnp.abs(b_offset)[None, :]
    om = jnp.abs(omega)[None, :]
    in_sum = x @ wT
    u_ref = u0 + b * u0 * dt - om * v0 * dt + in_sum * dt
    v_ref = v0 + om * u0 * dt + b * v0 * dt
    z_ref = (u_ref - theta > 0).astype(jnp.float32)
    assert jnp.allclose(u1, u_ref, atol=1e-5, rtol=1e-5)
    assert jnp.allclose(v1, v_ref, atol=1e-5, rtol=1e-5)
    # spikes: only allow disagreement within fp tolerance of the threshold
    assert not bool(jnp.any((z != z_ref) & (jnp.abs(u_ref - theta) > 1e-4)))

    # --- fused multi-timestep path (weights + state stay VMEM-resident),
    #     spike output emitted in bf16 (exact 0/1 values) ---
    xs = jax.random.normal(k_xs, (seq, batch, input_size), dtype=jnp.float32)
    z_seq, u_T, v_T = rf_cell_sequence(xs, wT, u0, v0, omega, b_offset,
                                       dt=dt, theta=theta, z_dtype=jnp.bfloat16)
    jax.block_until_ready((z_seq, u_T, v_T))

    # reference recurrence
    u_r, v_r = u0, v0
    z_r_steps, margins = [], []
    for t in range(seq):
        s = xs[t] @ wT
        u_n = u_r + b * u_r * dt - om * v_r * dt + s * dt
        v_n = v_r + om * u_r * dt + b * v_r * dt
        z_r_steps.append((u_n - theta > 0).astype(jnp.float32))
        margins.append(jnp.abs(u_n - theta))
        u_r, v_r = u_n, v_n
    z_r = jnp.stack(z_r_steps)
    margin = jnp.stack(margins)
    assert jnp.allclose(u_T, u_r, atol=1e-5, rtol=1e-5)
    assert jnp.allclose(v_T, v_r, atol=1e-5, rtol=1e-5)
    assert not bool(jnp.any((z_seq.astype(jnp.float32) != z_r) & (margin > 1e-4)))

    print("KERNEL_OK")
</pallas_src>

<mosaic_0001>
module attributes {stable_mosaic.version = 11 : i64} {
  func.func @_rf_step_kernel(%arg0: i32, %arg1: i32, %arg2: i32, %arg3: memref<8x128xf32, #tpu.memory_space<vmem>>, %arg4: memref<128x128xf32, #tpu.memory_space<vmem>>, %arg5: memref<8x128xf32, #tpu.memory_space<vmem>>, %arg6: memref<8x128xf32, #tpu.memory_space<vmem>>, %arg7: memref<1x128xf32, #tpu.memory_space<vmem>>, %arg8: memref<1x128xf32, #tpu.memory_space<vmem>>, %arg9: memref<8x128xf32, #tpu.memory_space<vmem>>, %arg10: memref<8x128xf32, #tpu.memory_space<vmem>>, %arg11: memref<8x128xf32, #tpu.memory_space<vmem>>, %arg12: memref<8x128xf32, #tpu.memory_space<vmem>>) attributes {dimension_semantics = [#tpu.dimension_semantics<parallel>, #tpu.dimension_semantics<parallel>, #tpu.dimension_semantics<arbitrary>], iteration_bounds = array<i64: 1, 1, 1>, scalar_prefetch = 0 : i64, scratch_operands = 1 : i64, tpu.core_type = #tpu.core_type<tc>, window_params = [{transform_indices = @transform_0, window_bounds = array<i64: 8, 128>}, {transform_indices = @transform_1, window_bounds = array<i64: 128, 128>}, {transform_indices = @transform_2, window_bounds = array<i64: 8, 128>}, {transform_indices = @transform_3, window_bounds = array<i64: 8, 128>}, {transform_indices = @transform_4, window_bounds = array<i64: 1, 128>}, {transform_indices = @transform_5, window_bounds = array<i64: 1, 128>}, {transform_indices = @transform_6, window_bounds = array<i64: 8, 128>}, {transform_indices = @transform_7, window_bounds = array<i64: 8, 128>}, {transform_indices = @transform_8, window_bounds = array<i64: 8, 128>}]} {
    %c0_i32 = arith.constant 0 : i32
    %0 = arith.cmpi eq, %arg2, %c0_i32 : i32
    %1 = arith.extui %0 : i1 to i32
    %c0_i32_0 = arith.constant 0 : i32
    %2 = arith.cmpi ne, %1, %c0_i32_0 : i32
    scf.if %2 {
      %cst_10 = arith.constant 0.000000e+00 : f32
      %12 = vector.broadcast %cst_10 : f32 to vector<8x128xf32>
      %c0_11 = arith.constant 0 : index
      %c0_12 = arith.constant 0 : index
      %13 = vector.load %arg12[%c0_11, %c0_12] : memref<8x128xf32, #tpu.memory_space<vmem>>, vector<8x128xf32>
      tpu.vector_store %arg12[%c0_11, %c0_12], %12 {strides = array<i32>} : memref<8x128xf32, #tpu.memory_space<vmem>>, vector<8x128xf32>,
    } else {
    }
    %c0 = arith.constant 0 : index
    %c0_1 = arith.constant 0 : index
    %3 = vector.load %arg12[%c0, %c0_1] : memref<8x128xf32, #tpu.memory_space<vmem>>, vector<8x128xf32>
    %c0_2 = arith.constant 0 : index
    %c0_3 = arith.constant 0 : index
    %4 = vector.load %arg3[%c0_2, %c0_3] : memref<8x128xf32, #tpu.memory_space<vmem>>, vector<8x128xf32>
    %c0_4 = arith.constant 0 : index
    %c0_5 = arith.constant 0 : index
    %5 = vector.load %arg4[%c0_4, %c0_5] : memref<128x128xf32, #tpu.memory_space<vmem>>, vector<128x128xf32>
    %cst = arith.constant dense<0.000000e+00> : vector<8x128xf32>
    %6 = tpu.matmul %4, %5, %cst {dimension_numbers = #tpu.dot_dimension_numbers<[1], [0], [0], [1], [0, 0, 1, 1], [], []>} : vector<8x128xf32>, vector<128x128xf32>, vector<8x128xf32> -> vector<8x128xf32>
    %7 = arith.addf %3, %6 : vector<8x128xf32>
    %c0_6 = arith.constant 0 : index
    %c0_7 = arith.constant 0 : index
    %8 = vector.load %arg12[%c0_6, %c0_7] : memref<8x128xf32, #tpu.memory_space<vmem>>, vector<8x128xf32>
    tpu.vector_store %arg12[%c0_6, %c0_7], %7 {strides = array<i32>} : memref<8x128xf32, #tpu.memory_space<vmem>>, vector<8x128xf32>,
    %c0_i32_8 = arith.constant 0 : i32
    %9 = arith.cmpi eq, %arg2, %c0_i32_8 : i32
    %10 = arith.extui %9 : i1 to i32
    %c0_i32_9 = arith.constant 0 : i32
    %11 = arith.cmpi ne, %10, %c0_i32_9 : i32
    scf.if %11 {
      %c0_10 = arith.constant 0 : index
      %c0_11 = arith.constant 0 : index
      %12 = vector.load %arg5[%c0_10, %c0_11] : memref<8x128xf32, #tpu.memory_space<vmem>>, vector<8x128xf32>
      %c0_12 = arith.constant 0 : index
      %c0_13 = arith.constant 0 : index
      %13 = vector.load %arg6[%c0_12, %c0_13] : memref<8x128xf32, #tpu.memory_space<vmem>>, vector<8x128xf32>
      %c0_14 = arith.constant 0 : index
      %c0_15 = arith.constant 0 : index
      %14 = vector.load %arg7[%c0_14, %c0_15] : memref<1x128xf32, #tpu.memory_space<vmem>>, vector<1x128xf32>
      %c0_16 = arith.constant 0 : index
      %c0_17 = arith.constant 0 : index
      %15 = vector.load %arg8[%c0_16, %c0_17] : memref<1x128xf32, #tpu.memory_space<vmem>>, vector<1x128xf32>
      %16 = vector.broadcast %14 : vector<1x128xf32> to vector<8x128xf32>
      %17 = arith.mulf %16, %12 : vector<8x128xf32>
      %18 = vector.broadcast %15 : vector<1x128xf32> to vector<8x128xf32>
      %19 = arith.mulf %18, %13 : vector<8x128xf32>
      %20 = arith.subf %17, %19 : vector<8x128xf32>
      %c0_18 = arith.constant 0 : index
      %c0_19 = arith.constant 0 : index
      %21 = vector.load %arg12[%c0_18, %c0_19] : memref<8x128xf32, #tpu.memory_space<vmem>>, vector<8x128xf32>
      %cst_20 = arith.constant 0.00999999977 : f32
      %22 = vector.broadcast %cst_20 : f32 to vector<8x128xf32>
      %23 = arith.mulf %21, %22 : vector<8x128xf32>
      %24 = arith.addf %20, %23 : vector<8x128xf32>
      %25 = vector.broadcast %15 : vector<1x128xf32> to vector<8x128xf32>
      %26 = arith.mulf %25, %12 : vector<8x128xf32>
      %27 = vector.broadcast %14 : vector<1x128xf32> to vector<8x128xf32>
      %28 = arith.mulf %27, %13 : vector<8x128xf32>
      %29 = arith.addf %26, %28 : vector<8x128xf32>
      %cst_21 = arith.constant 1.000000e-01 : f32
      %30 = vector.broadcast %cst_21 : f32 to vector<8x128xf32>
      %31 = arith.subf %24, %30 : vector<8x128xf32>
      %cst_22 = arith.constant 0.000000e+00 : f32
      %32 = vector.broadcast %cst_22 : f32 to vector<8x128xf32>
      %33 = arith.cmpf ogt, %31, %32 : vector<8x128xf32>
      %34 = arith.extui %33 : vector<8x128xi1> to vector<8x128xi32>
      %35 = arith.sitofp %34 : vector<8x128xi32> to vector<8x128xf32>
      %c0_23 = arith.constant 0 : index
      %c0_24 = arith.constant 0 : index
      %36 = vector.load %arg9[%c0_23, %c0_24] : memref<8x128xf32, #tpu.memory_space<vmem>>, vector<8x128xf32>
      tpu.vector_store %arg9[%c0_23, %c0_24], %35 {strides = array<i32>} : memref<8x128xf32, #tpu.memory_space<vmem>>, vector<8x128xf32>,
      %c0_25 = arith.constant 0 : index
      %c0_26 = arith.constant 0 : index
      %37 = vector.load %arg10[%c0_25, %c0_26] : memref<8x128xf32, #tpu.memory_space<vmem>>, vector<8x128xf32>
      tpu.vector_store %arg10[%c0_25, %c0_26], %24 {strides = array<i32>} : memref<8x128xf32, #tpu.memory_space<vmem>>, vector<8x128xf32>,
      %c0_27 = arith.constant 0 : index
      %c0_28 = arith.constant 0 : index
      %38 = vector.load %arg11[%c0_27, %c0_28] : memref<8x128xf32, #tpu.memory_space<vmem>>, vector<8x128xf32>
      tpu.vector_store %arg11[%c0_27, %c0_28], %29 {strides = array<i32>} : memref<8x128xf32, #tpu.memory_space<vmem>>, vector<8x128xf32>,
    } else {
    }
    return
  }
  func.func @transform_0(%arg0: i32, %arg1: i32, %arg2: i32) -> (i32, i32) {
    %c0_i32 = arith.constant 0 : i32
    return %arg0, %arg2 : i32, i32
  }
  func.func @transform_1(%arg0: i32, %arg1: i32, %arg2: i32) -> (i32, i32) {
    %c0_i32 = arith.constant 0 : i32
    return %arg2, %arg1 : i32, i32
  }
  func.func @transform_2(%arg0: i32, %arg1: i32, %arg2: i32) -> (i32, i32) {
    %c0_i32 = arith.constant 0 : i32
    return %arg0, %arg1 : i32, i32
  }
  func.func @transform_3(%arg0: i32, %arg1: i32, %arg2: i32) -> (i32, i32) {
    %c0_i32 = arith.constant 0 : i32
    return %arg0, %arg1 : i32, i32
  }
  func.func @transform_4(%arg0: i32, %arg1: i32, %arg2: i32) -> (i32, i32) {
    %c0_i32 = arith.constant 0 : i32
    %c0_i32_0 = arith.constant 0 : i32
    return %c0_i32, %arg1 : i32, i32
  }
  func.func @transform_5(%arg0: i32, %arg1: i32, %arg2: i32) -> (i32, i32) {
    %c0_i32 = arith.constant 0 : i32
    %c0_i32_0 = arith.constant 0 : i32
    return %c0_i32, %arg1 : i32, i32
  }
  func.func @transform_6(%arg0: i32, %arg1: i32, %arg2: i32) -> (i32, i32) {
    %c0_i32 = arith.constant 0 : i32
    return %arg0, %arg1 : i32, i32
  }
  func.func @transform_7(%arg0: i32, %arg1: i32, %arg2: i32) -> (i32, i32) {
    %c0_i32 = arith.constant 0 : i32
    return %arg0, %arg1 : i32, i32
  }
  func.func @transform_8(%arg0: i32, %arg1: i32, %arg2: i32) -> (i32, i32) {
    %c0_i32 = arith.constant 0 : i32
    return %arg0, %arg1 : i32, i32
  }
}

</mosaic_0001>

<bundles_post_ra>
// kernel: tpu_custom_call.1
= control target key start
LH: loop header
LB: loop body
LE: loop exit
PB: predicated region body
PF: predicated region fallthrough
CT: control target
= control target key end

     0   :  { %14 = vsyncpa [#allocation4], 0  ;;  %s622_s0 = inlined_call_operand.hbm [shape: f32[8,128], index: 0, kind: input, shape index: {}]   ;;  %s623_s1 = inlined_call_operand.hbm [shape: f32[128,128], index: 1, kind: input, shape index: {}]   ;;  %s624_s2 = inlined_call_operand.hbm [shape: f32[8,128], index: 2, kind: input, shape index: {}]   ;;  %s625_s3 = inlined_call_operand.vmem [shape: f32[8,128], index: 3, kind: input, shape index: {}]   ;;  %s626_s4 = inlined_call_operand.vmem [shape: f32[1,128], index: 4, kind: input, shape index: {}]   ;;  %s627_s5 = inlined_call_operand.vmem [shape: f32[1,128], index: 5, kind: input, shape index: {}]   ;;  %s628_s6 = inlined_call_operand.hbm [shape: f32[8,128], index: 6, kind: output, shape index: {0}]   ;;  %s629_s7 = inlined_call_operand.hbm [shape: f32[8,128], index: 7, kind: output, shape index: {1}]   ;;  %s630_s8 = inlined_call_operand.hbm [shape: f32[8,128], index: 8, kind: output, shape index: {2}]  }
   0x1   :  { %15 = vsyncpa [#allocation7], 0 }
   0x2   :  { %16 = vsyncpa [#allocation5], 0 }
   0x3   :  { %17 = vsyncpa [#allocation11], 0  ;;  %s469_s27 = smov [#allocation6]   ;;  %s329_s9 = scalar_lea.hbm %s623_s1, 2048 }
   0x4   :  { %s33_s28 = sshll.u32 %s469_s27, 4  ;;  %p330_p0 = scmp.ne.s32.totalorder %s623_s1, %s329_s9  ;;  %s34_s28 = int_to_ptr.vmem [resolvable:$true] %s33_s28 }
   0x5   :  { %p333_p1 = scmp.lt.u32.totalorder %s329_s9, %s623_s1 }
   0x7   :  { %p335_p2 = pnand %p333_p1, %p330_p0 }
   0x9   :  { %338 = shalt.err (!%p335_p2)
}
   0xa   :  { %s339_s14 = scalar_lea.vmem %s34_s28, 2048  ;;  %p344_p4 = scmp.lt.s32.totalorder %s34_s28, %s34_s28 }
   0xb   :  { %p340_p3 = scmp.ne.s32.totalorder %s34_s28, %s339_s14  ;;  %p345_p5 = scmp.lt.s32.totalorder %s339_s14, %s339_s14 }
   0xd   :  { %p346_p6 = por %p345_p5, %p344_p4 }
   0xf   :  { %p347_p7 = pnand %p346_p6, %p340_p3 }
  0x11   :  { %350 = shalt.err (!%p347_p7)
}
  0x12   :  { %s470_s15 = smov 128   ;;  %s471_s16 = smov 8  }
  0x13   :  { %39 = dma.hbm_to_vmem [thread:$0]  %s623_s1, 2048, %s34_s28, [#allocation7], %s470_s15, %s470_s15, %s471_s16  }
  0x14   :  { %s472_s19 = smov [#allocation3]   ;;  %s473_s21 = smov [#allocation8]  }
  0x15   :  { %s24_s20 = sshll.u32 %s472_s19, 4  ;;  %s46_s22 = sshll.u32 %s473_s21, 4  ;;  %s25_s20 = int_to_ptr.vmem [resolvable:$true] %s24_s20  ;;  %s47_s22 = int_to_ptr.vmem [resolvable:$true] %s46_s22 }
  0x16   :  { %s351_s25 = scalar_lea.hbm %s622_s0, 128 }
  0x17   :  { %p352_p8 = scmp.ne.s32.totalorder %s622_s0, %s351_s25  ;;  %p355_p9 = scmp.lt.u32.totalorder %s351_s25, %s622_s0 }
  0x19   :  { %p357_p10 = pnand %p355_p9, %p352_p8 }
  0x1b   :  { %360 = shalt.err (!%p357_p10)
}
  0x1c   :  { %s361_s1 = scalar_lea.vmem %s25_s20, 128  ;;  %p366_p12 = scmp.lt.s32.totalorder %s25_s20, %s25_s20 }
  0x1d   :  { %p362_p11 = scmp.ne.s32.totalorder %s25_s20, %s361_s1  ;;  %p367_p13 = scmp.lt.s32.totalorder %s361_s1, %s361_s1 }
  0x1f   :  { %p368_p0 = por %p367_p13, %p366_p12 }
  0x21   :  { %p369_p1 = pnand %p368_p0, %p362_p11 }
  0x23   :  { %372 = shalt.err (!%p369_p1)
}
  0x24   :  { %27 = dma.hbm_to_vmem [thread:$0]  %s622_s0, 128, %s25_s20, [#allocation4]  }
  0x25   :  { %s373_s12 = scalar_lea.hbm %s624_s2, 128 }
  0x26   :  { %p374_p2 = scmp.ne.s32.totalorder %s624_s2, %s373_s12  ;;  %p377_p3 = scmp.lt.u32.totalorder %s373_s12, %s624_s2 }
  0x28   :  { %p379_p4 = pnand %p377_p3, %p374_p2 }
  0x2a   :  { %382 = shalt.err (!%p379_p4)
}
  0x2b   :  { %s383_s17 = scalar_lea.vmem %s47_s22, 128  ;;  %p388_p6 = scmp.lt.s32.totalorder %s47_s22, %s47_s22 }
  0x2c   :  { %p384_p5 = scmp.ne.s32.totalorder %s47_s22, %s383_s17  ;;  %p389_p7 = scmp.lt.s32.totalorder %s383_s17, %s383_s17 }
  0x2e   :  { %p390_p8 = por %p389_p7, %p388_p6 }
  0x30   :  { %p391_p9 = pnand %p390_p8, %p384_p5 }
  0x32   :  { %394 = shalt.err (!%p391_p9)
}
  0x33   :  { %49 = dma.hbm_to_vmem [thread:$0]  %s624_s2, 128, %s47_s22, [#allocation7]  }
  0x34   :  { %461 = dma.done.wait [#allocation4], 128  }
  0x35   :  { %462 = vsyncadd [#allocation4], 4294967168 }
  0x36   :  { %463 = dma.done.wait [#allocation7], 2176  }
  0x37   :  { %464 = vsyncadd [#allocation7], 4294965120  ;;  %v474_v0 = vmov 0.0|0.0   ;;  %vm475_vm0 = vmmov 0   ;;  %v476_v1 = vmov 0.0   ;;  %v72_v2 = vld [vmem:[#allocation6] sm:$0xff] }
  0x38   :  { %294 = vmatprep.subr.bf16.mxu0 %v474_v0  ;;  %291 = vmatprep.mubr.msk.f32.mxu0 %vm475_vm0, %v476_v1  ;;  %v73_v3 = vld [vmem:[#allocation6 + $0x8] sm:$0xff]  ;;  %v74_v4 = vld [vmem:[#allocation6 + $0x10] sm:$0xff]  ;;  %v75_v6 = vld [vmem:[#allocation6 + $0x18] sm:$0xff]  ;;  %s477_s24 = smov [#allocation10]   ;;  %s479_s27 = smov [#allocation9]  }
  0x39   :  { %v295_v5 = vpack.c.bf16 %v73_v3, %v72_v2  ;;  %v298_v7 = vpack.c.bf16 %v75_v6, %v74_v4  ;;  %v76_v8 = vld [vmem:[#allocation6 + $0x20] sm:$0xff]  ;;  %v77_v9 = vld [vmem:[#allocation6 + $0x28] sm:$0xff]  ;;  %v78_v11 = vld [vmem:[#allocation6 + $0x30] sm:$0xff]  ;;  %s211_s25 = sshll.u32 %s477_s24, 4  ;;  %s212_s25 = int_to_ptr.vmem [resolvable:$true] %s211_s25 }
  0x3a   :  { %v301_v10 = vpack.c.bf16 %v77_v9, %v76_v8  ;;  %v79_v12 = vld [vmem:[#allocation6 + $0x38] sm:$0xff]  ;;  %v80_v14 = vld [vmem:[#allocation6 + $0x40] sm:$0xff]  ;;  %v81_v15 = vld [vmem:[#allocation6 + $0x48] sm:$0xff]  ;;  %p400_p11 = scmp.lt.s32.totalorder %s212_s25, %s212_s25 }
  0x3b   :  { %296 = vmatpush3.bf16.msra.mxu0 %v295_v5  ;;  %v304_v13 = vpack.c.bf16 %v79_v12, %v78_v11  ;;  %v307_v16 = vpack.c.bf16 %v81_v15, %v80_v14  ;;  %v82_v17 = vld [vmem:[#allocation6 + $0x50] sm:$0xff]  ;;  %v83_v18 = vld [vmem:[#allocation6 + $0x58] sm:$0xff]  ;;  %v84_v20 = vld [vmem:[#allocation6 + $0x60] sm:$0xff] }
  0x3c   :  { %297 = vmatprep.subr.bf16.mxu0 %v474_v0  ;;  %v310_v19 = vpack.c.bf16 %v83_v18, %v82_v17  ;;  %v85_v21 = vld [vmem:[#allocation6 + $0x68] sm:$0xff]  ;;  %v86_v23 = vld [vmem:[#allocation6 + $0x70] sm:$0xff]  ;;  %v87_v24 = vld [vmem:[#allocation6 + $0x78] sm:$0xff] }
  0x3d   :  { %v313_v22 = vpack.c.bf16 %v85_v21, %v84_v20  ;;  %v316_v25 = vpack.c.bf16 %v87_v24, %v86_v23  ;;  %v71_v26 = vld [vmem:[#allocation3] sm:$0xff]  ;;  %v163_v27 = vld [vmem:[#allocation8] sm:$0xff] }
  0x3e   :  { %v164_v28 = vld [vmem:[%s625_s3] sm:$0xff]  ;;  %s478_s3 = smov [#allocation12]  }
  0x3f   :  { %299 = vmatpush3.bf16.msra.mxu0 %v298_v7  ;;  %v238_v29 = vld [vmem:[%s626_s4] ss:$0 sm:$0xff]  ;;  %s221_s26 = sshll.u32 %s478_s3, 4  ;;  %s201_s4 = sshll.u32 %s479_s27, 4  ;;  %s571_s26 = int_to_ptr.vmem [resolvable:$true] %s221_s26  ;;  %s573_s4 = int_to_ptr.vmem [resolvable:$true] %s201_s4 }
  0x40   :  { %300 = vmatprep.subr.bf16.mxu0 %v474_v0  ;;  %v239_v30 = vld [vmem:[%s627_s5] ss:$0 sm:$0xff]  ;;  %v173_v31 = vmul.f32 %v238_v29, %v163_v27  ;;  %v186_v35 = vmul.f32 %v238_v29, %v164_v28  ;;  %s395_s5 = scalar_lea.vmem %s212_s25, 128 }
  0x41   :  { %v180_v32 = vmul.f32 %v239_v30, %v164_v28  ;;  %v185_v34 = vmul.f32 %v239_v30, %v163_v27  ;;  %p396_p10 = scmp.ne.s32.totalorder %s212_s25, %s395_s5  ;;  %p401_p12 = scmp.lt.s32.totalorder %s395_s5, %s395_s5 }
  0x43   :  { %302 = vmatpush3.bf16.msra.mxu0 %v301_v10  ;;  %v181_v33 = vsub.f32 %v173_v31, %v180_v32  ;;  %v187_v36 = vadd.f32 %v186_v35, %v185_v34  ;;  %p402_p13 = por %p401_p12, %p400_p11 }
  0x44   :  { %303 = vmatprep.subr.bf16.mxu0 %v474_v0 }
  0x45   :  { %194 = vst [vmem:[#allocation12] sm:$0xff] %v187_v36  ;;  %p403_p0 = pnand %p402_p13, %p396_p10 }
  0x47   :  { %305 = vmatpush3.bf16.msra.mxu0 %v304_v13 }
  0x48   :  { %306 = vmatprep.subr.bf16.mxu0 %v474_v0 }
  0x4b   :  { %308 = vmatpush3.bf16.msra.mxu0 %v307_v16 }
  0x4c   :  { %309 = vmatprep.subr.bf16.mxu0 %v474_v0 }
  0x4f   :  { %311 = vmatpush3.bf16.msra.mxu0 %v310_v19 }
  0x50   :  { %312 = vmatprep.subr.bf16.mxu0 %v474_v0 }
  0x53   :  { %314 = vmatpush3.bf16.msra.mxu0 %v313_v22 }
  0x54   :  { %315 = vmatprep.subr.bf16.mxu0 %v474_v0 }
  0x57   :  { %317 = vmatpush3.bf16.msra.mxu0 %v316_v25 }
  0x5a   :  { %292 = vmatmul.mubr.f32.vlgmr.msra.gmra.mrb[0].mxu0 %v71_v26 }
 0x12d   :  { %v154_v37 = vpop.f32.mrb[0].mxu0 }
 0x12e   :  { %v183_v38 = vmul.f32 0.01, %v154_v37  ;;  %v293_v39 = vpop.f32.mrb[1].mxu0 }
 0x130   :  { %v184_v40 = vadd.f32 %v183_v38, %v181_v33 }
 0x132   :  { %193 = vst [vmem:[#allocation10] sm:$0xff] %v184_v40  ;;  %v240_v41 = vadd.f32 -0.1, %v184_v40 }
 0x133   :  { %406 = shalt.err (!%p403_p0)
}
 0x134   :  { %s407_s1 = scalar_lea.hbm %s629_s7, 128 }
 0x135   :  { %p408_p1 = scmp.ne.s32.totalorder %s629_s7, %s407_s1  ;;  %p411_p2 = scmp.lt.u32.totalorder %s407_s1, %s629_s7 }
 0x137   :  { %p413_p3 = pnand %p411_p2, %p408_p1 }
 0x139   :  { %416 = shalt.err (!%p413_p3)
}
 0x13a   :  { %214 = dma.vmem_to_hbm [thread:$0]  %s212_s25, 128, %s629_s7, [#allocation11]   ;;  %vm189_vm1 = vcmp.gt.f32.partialorder %v240_v41, 0.0 }
 0x13b   :  { %s417_s14 = scalar_lea.vmem %s571_s26, 128  ;;  %p422_p5 = scmp.lt.s32.totalorder %s571_s26, %s571_s26 }
 0x13c   :  { %p418_p4 = scmp.ne.s32.totalorder %s571_s26, %s417_s14  ;;  %p423_p6 = scmp.lt.s32.totalorder %s417_s14, %s417_s14 }
 0x13e   :  { %p424_p7 = por %p423_p6, %p422_p5 }
 0x140   :  { %p425_p8 = pnand %p424_p7, %p418_p4 }
 0x142   :  { %428 = shalt.err (!%p425_p8)
}
 0x143   :  { %s429_s17 = scalar_lea.hbm %s630_s8, 128 }
 0x144   :  { %p430_p9 = scmp.ne.s32.totalorder %s630_s8, %s429_s17  ;;  %p433_p10 = scmp.lt.u32.totalorder %s429_s17, %s630_s8 }
 0x146   :  { %p435_p11 = pnand %p433_p10, %p430_p9 }
 0x148   :  { %438 = shalt.err (!%p435_p11)
}
 0x149   :  { %224 = dma.vmem_to_hbm [thread:$0]  %s571_s26, 128, %s630_s8, [#allocation11]   ;;  %v241_v42 = vsel %vm189_vm1, 1.0, %v476_v1 }
 0x14a   :  { %192 = vst [vmem:[#allocation9] sm:$0xff] %v241_v42  ;;  %s439_s21 = scalar_lea.vmem %s573_s4, 128  ;;  %p444_p13 = scmp.lt.s32.totalorder %s573_s4, %s573_s4 }
 0x14b   :  { %p440_p12 = scmp.ne.s32.totalorder %s573_s4, %s439_s21  ;;  %p445_p0 = scmp.lt.s32.totalorder %s439_s21, %s439_s21 }
 0x14d   :  { %p446_p1 = por %p445_p0, %p444_p13 }
 0x14f   :  { %p447_p2 = pnand %p446_p1, %p440_p12 }
 0x151   :  { %450 = shalt.err (!%p447_p2)
}
 0x152   :  { %s451_s24 = scalar_lea.hbm %s628_s6, 128 }
 0x153   :  { %p452_p3 = scmp.ne.s32.totalorder %s628_s6, %s451_s24  ;;  %p455_p4 = scmp.lt.u32.totalorder %s451_s24, %s628_s6 }
 0x155   :  { %p457_p5 = pnand %p455_p4, %p452_p3 }
 0x157   :  { %460 = shalt.err (!%p457_p5)
}
 0x158   :  { %204 = dma.vmem_to_hbm [thread:$0]  %s573_s4, 128, %s628_s6, [#allocation5]  }
 0x159   :  { %465 = dma.done.wait [#allocation5], 128  }
 0x15a   :  { %466 = vsyncadd [#allocation5], 4294967168 }
 0x15b   :  { %467 = dma.done.wait [#allocation11], 256  }
 0x15c   :  { %468 = vsyncadd [#allocation11], 4294967040 }
 0x15d   :  { %234 = vsyncpa [#allocation4], 1 }
 0x15e   :  { %235 = vsyncpa [#allocation7], 1 }
 0x15f   :  { %236 = vsyncpa [#allocation5], 1 }
 0x160   :  { %237 = vsyncpa [#allocation11], 1 }

</bundles_post_ra>
